<compile_context>
chip_gen: v7x
topology: tpu7x:2x2x1
jax: 0.10.0
libtpu: 0.0.40
codegen_flags: <defaults>
</compile_context>

<pallas_src>
import functools
import math

import jax
import jax.numpy as jnp
import numpy as np
from jax.experimental import pallas as pl
from jax.experimental.pallas import tpu as pltpu


# --------------------------------------------------------------------------- #
# Tiling helpers
# --------------------------------------------------------------------------- #
def _sublane(itemsize):
    """Sublane multiple for VMEM tiling at this dtype width."""
    return {4: 8, 2: 16, 1: 32}.get(itemsize, 8)


def _round_up(x, m):
    return (x + m - 1) // m * m


def _default_vmem_budget():
    """Generation-aware per-block VMEM budget: ~1/4 of capacity, capped at 32 MiB."""
    try:
        cap = pltpu.get_tpu_info().vmem_capacity_bytes
    except Exception:
        cap = 64 << 20  # conservative (v7x-sized) fallback
    return int(max(4 << 20, min(cap // 4, 32 << 20)))


def _dense_footprint(tb, lane_elems, itemsize):
    # input block + output block, each double-buffered by the Pallas pipeline,
    # with batch rows rounded up to the sublane multiple (real VMEM footprint).
    return 4 * _round_up(tb, _sublane(itemsize)) * lane_elems * itemsize


def _pick_batch_tile(B, lane_elems, itemsize, budget):
    """Largest batch tile (dividing B, sublane-legal) whose blocks fit the budget."""
    sub = _sublane(itemsize)
    if _dense_footprint(1, lane_elems, itemsize) > budget:
        return None
    for tb in range(B, 0, -1):
        if B % tb:
            continue
        if tb != B and tb % sub:          # keep the sublane block dim (8,128)-legal
            continue
        if _dense_footprint(tb, lane_elems, itemsize) <= budget:
            return tb
    return None


def _smallest_legal_tb(B, itemsize):
    sub = _sublane(itemsize)
    for tb in range(1, B + 1):
        if B % tb == 0 and (tb == B or tb % sub == 0):
            return tb
    return B


def _pick_hw_tile(HW, C, itemsize, budget):
    """Largest lane tile (multiple of 128 dividing HW) whose blocks fit the budget."""
    if HW % 128:
        return None
    c_pad = _round_up(C, _sublane(itemsize))
    max_hw = budget // (4 * c_pad * itemsize)
    max_hw = (min(max_hw, HW) // 128) * 128
    for hw_t in range(max_hw, 0, -128):
        if HW % hw_t == 0:
            return hw_t
    return None


# --------------------------------------------------------------------------- #
# Kernels
# --------------------------------------------------------------------------- #
def _sa_dense_kernel(x_ref, w_ref, b_ref, o_ref, *, C, HW):
    """Dense 2D tile: x_ref (tb, C*HW); w_ref SMEM (C,); b_ref SMEM (1,).

    1x1 conv == per-pixel weighted channel sum.  C is tiny, so it is unrolled
    as lane-aligned slice FMAs on the VPU (an M-tiny matmul would waste the MXU).
    """
    # TODO(synk): for C >= ~16 push the channel reduction onto the MXU instead.
    logits = x_ref[:, 0:HW].astype(jnp.float32) * w_ref[0]
    for c in range(1, C):
        logits = logits + x_ref[:, c * HW:(c + 1) * HW].astype(jnp.float32) * w_ref[c]
    # Exact sigmoid: exp on the EUP + one divide; matches torch.sigmoid in f32.
    att = 1.0 / (1.0 + jnp.exp(-(logits + b_ref[0])))
    att = att.astype(x_ref.dtype)          # gate in the input dtype (bf16 stays bf16)
    for c in range(C):
        sl = slice(c * HW, (c + 1) * HW)
        o_ref[:, sl] = (x_ref[:, sl] * att).astype(o_ref.dtype)


def _sa_tiled_kernel(x_ref, w_ref, b_ref, o_ref, *, C):
    """HW-tiled fallback: x_ref (1, C, hw_t) — one batch row, one lane tile."""
    logits = x_ref[:, 0, :].astype(jnp.float32) * w_ref[0]
    for c in range(1, C):
        logits = logits + x_ref[:, c, :].astype(jnp.float32) * w_ref[c]
    att = 1.0 / (1.0 + jnp.exp(-(logits + b_ref[0])))
    att = att.astype(x_ref.dtype)
    for c in range(C):
        o_ref[:, c, :] = (x_ref[:, c, :] * att).astype(o_ref.dtype)


# --------------------------------------------------------------------------- #
# Wrapper
# --------------------------------------------------------------------------- #
def spatial_attention_forward(x, conv_w, conv_b, *, vmem_block_budget_bytes=None):
    """Pallas forward of SpatialAttention.

    x:      (B, C, H, W)
    conv_w: (1, C, 1, 1)   (torch nn.Conv2d(in_channels, 1, 1).weight)
    conv_b: (1,)           (torch bias)
    returns x * sigmoid(conv1x1(x)), shape (B, C, H, W)
    """
    B, C, H, W = x.shape
    HW = H * W
    itemsize = x.dtype.itemsize
    budget = int(vmem_block_budget_bytes) if vmem_block_budget_bytes else _default_vmem_budget()

    w1d = conv_w.reshape(C).astype(jnp.float32)   # SMEM scalars (32-bit words)
    b1d = conv_b.reshape(1).astype(jnp.float32)
    smem_spec = pl.BlockSpec(memory_space=pltpu.MemorySpace.SMEM)

    cost = pl.CostEstimate(
        flops=3 * B * C * HW,                                  # conv MACs + gating mul
        transcendentals=B * HW,                                # one exp per pixel
        bytes_accessed=2 * B * C * HW * itemsize + (C + 1) * 4,
    )

    hw_t = None
    tb = _pick_batch_tile(B, C * HW, itemsize, budget)
    if tb is None:
        hw_t = _pick_hw_tile(HW, C, itemsize, budget)
    if tb is None and hw_t is None:
        # TODO(synk): masked lane tiling for huge H*W not divisible by 128; fall
        # back to the smallest legal dense tile and let the compiler schedule it.
        tb = _smallest_legal_tb(B, itemsize)

    if hw_t is None:
        # ---- dense 2D path: (B, C*HW), batch on sublanes, lanes 100% dense ----
        footprint = _dense_footprint(tb, C * HW, itemsize)
        vmem_limit = int(min(max(footprint + (4 << 20), 16 << 20), 100 << 20))
        x2 = x.reshape(B, C * HW)
        out = pl.pallas_call(
            functools.partial(_sa_dense_kernel, C=C, HW=HW),
            out_shape=jax.ShapeDtypeStruct((B, C * HW), x.dtype),
            grid_spec=pltpu.PrefetchScalarGridSpec(
                num_scalar_prefetch=0,
                grid=(B // tb,),
                in_specs=[
                    pl.BlockSpec((tb, C * HW), lambda i: (i, 0)),  # batch tile marches
                    smem_spec,                                     # conv weight (C,)
                    smem_spec,                                     # conv bias (1,)
                ],
                out_specs=pl.BlockSpec((tb, C * HW), lambda i: (i, 0)),
            ),
            compiler_params=pltpu.CompilerParams(
                dimension_semantics=("parallel",),
                vmem_limit_bytes=vmem_limit,
            ),
            cost_estimate=cost,
        )(x2, w1d, b1d)
        return out.reshape(B, C, H, W)

    # ---- HW-tiled fallback: (B, C, HW) with 128-multiple lane tiles ----
    c_pad = _round_up(C, _sublane(itemsize))
    footprint = 4 * c_pad * hw_t * itemsize
    vmem_limit = int(min(max(footprint + (4 << 20), 16 << 20), 100 << 20))
    x3 = x.reshape(B, C, HW)
    out = pl.pallas_call(
        functools.partial(_sa_tiled_kernel, C=C),
        out_shape=jax.ShapeDtypeStruct((B, C, HW), x.dtype),
        grid_spec=pltpu.PrefetchScalarGridSpec(
            num_scalar_prefetch=0,
            grid=(B, HW // hw_t),
            in_specs=[
                pl.BlockSpec((1, C, hw_t), lambda b, h: (b, 0, h)),
                smem_spec,
                smem_spec,
            ],
            out_specs=pl.BlockSpec((1, C, hw_t), lambda b, h: (b, 0, h)),
        ),
        compiler_params=pltpu.CompilerParams(
            dimension_semantics=("parallel", "parallel"),
            vmem_limit_bytes=vmem_limit,
        ),
        cost_estimate=cost,
    )(x3, w1d, b1d)
    return out.reshape(B, C, H, W)


# --------------------------------------------------------------------------- #
# Params init + reference
# --------------------------------------------------------------------------- #
def init_spatial_attention_params(key, in_channels):
    """Mirror torch nn.Conv2d default init (uniform +-1/sqrt(fan_in), fan_in = C)."""
    kw, kb = jax.random.split(key)
    bound = 1.0 / math.sqrt(in_channels)
    w = jax.random.uniform(kw, (1, in_channels, 1, 1), jnp.float32, -bound, bound)
    b = jax.random.uniform(kb, (1,), jnp.float32, -bound, bound)
    return w, b


def spatial_attention_reference(x, conv_w, conv_b):
    """Plain-JAX reference for verification."""
    logits = jnp.einsum("bchw,c->bhw", x, conv_w.reshape(-1)) + conv_b.reshape(())
    att = 1.0 / (1.0 + jnp.exp(-logits))
    return x * att[:, None, :, :]


if __name__ == "__main__":
    # SpatialAttention(in_channels=4) applied to x of shape (2, 4, 16, 16).
    B, C, H, W = 2, 4, 16, 16

    key = jax.random.PRNGKey(0)
    key, kx, kp = jax.random.split(key, 3)
    conv_w, conv_b = init_spatial_attention_params(kp, C)
    x = jax.random.normal(kx, (B, C, H, W), jnp.float32)

    ref = spatial_attention_reference(x, conv_w, conv_b)

    # Main (dense 2D) path.
    out = jax.block_until_ready(spatial_attention_forward(x, conv_w, conv_b))
    assert out.shape == (B, C, H, W), out.shape
    np.testing.assert_allclose(np.asarray(out), np.asarray(ref), rtol=1e-5, atol=1e-6)

    # Force the HW-tiled fallback (tiny budget) so both code paths are exercised.
    out_tiled = jax.block_until_ready(
        spatial_attention_forward(x, conv_w, conv_b, vmem_block_budget_bytes=64 * 1024))
    np.testing.assert_allclose(np.asarray(out_tiled), np.asarray(ref), rtol=1e-5, atol=1e-6)

    print("KERNEL_OK")
</pallas_src>

<mosaic_0001>
module attributes {stable_mosaic.version = 11 : i64} {
  func.func @_sa_dense_kernel(%arg0: i32, %arg1: memref<2x1024xf32, #tpu.memory_space<vmem>>, %arg2: memref<4xf32, #tpu.memory_space<smem>>, %arg3: memref<1xf32, #tpu.memory_space<smem>>, %arg4: memref<2x1024xf32, #tpu.memory_space<vmem>>) attributes {dimension_semantics = [#tpu.dimension_semantics<parallel>], iteration_bounds = array<i64: 1>, scalar_prefetch = 0 : i64, scratch_operands = 0 : i64, tpu.core_type = #tpu.core_type<tc>, window_params = [{transform_indices = @transform_0, window_bounds = array<i64: 2, 1024>}, {transform_indices = @transform_1, window_bounds = array<i64: 4>}, {transform_indices = @transform_2, window_bounds = array<i64: 1>}, {transform_indices = @transform_3, window_bounds = array<i64: 2, 1024>}]} {
    %c0 = arith.constant 0 : index
    %c0_0 = arith.constant 0 : index
    %0 = vector.load %arg1[%c0, %c0_0] : memref<2x1024xf32, #tpu.memory_space<vmem>>, vector<2x256xf32>
    %c0_1 = arith.constant 0 : index
    %1 = memref.load %arg2[%c0_1] : memref<4xf32, #tpu.memory_space<smem>>
    %2 = vector.broadcast %1 : f32 to vector<2x256xf32>
    %3 = arith.mulf %0, %2 : vector<2x256xf32>
    %c0_2 = arith.constant 0 : index
    %c256 = arith.constant 256 : index
    %4 = vector.load %arg1[%c0_2, %c256] : memref<2x1024xf32, #tpu.memory_space<vmem>>, vector<2x256xf32>
    %c1 = arith.constant 1 : index
    %5 = memref.load %arg2[%c1] : memref<4xf32, #tpu.memory_space<smem>>
    %6 = vector.broadcast %5 : f32 to vector<2x256xf32>
    %7 = arith.mulf %4, %6 : vector<2x256xf32>
    %8 = arith.addf %3, %7 : vector<2x256xf32>
    %c0_3 = arith.constant 0 : index
    %c512 = arith.constant 512 : index
    %9 = vector.load %arg1[%c0_3, %c512] : memref<2x1024xf32, #tpu.memory_space<vmem>>, vector<2x256xf32>
    %c2 = arith.constant 2 : index
    %10 = memref.load %arg2[%c2] : memref<4xf32, #tpu.memory_space<smem>>
    %11 = vector.broadcast %10 : f32 to vector<2x256xf32>
    %12 = arith.mulf %9, %11 : vector<2x256xf32>
    %13 = arith.addf %8, %12 : vector<2x256xf32>
    %c0_4 = arith.constant 0 : index
    %c768 = arith.constant 768 : index
    %14 = vector.load %arg1[%c0_4, %c768] : memref<2x1024xf32, #tpu.memory_space<vmem>>, vector<2x256xf32>
    %c3 = arith.constant 3 : index
    %15 = memref.load %arg2[%c3] : memref<4xf32, #tpu.memory_space<smem>>
    %16 = vector.broadcast %15 : f32 to vector<2x256xf32>
    %17 = arith.mulf %14, %16 : vector<2x256xf32>
    %18 = arith.addf %13, %17 : vector<2x256xf32>
    %c0_5 = arith.constant 0 : index
    %19 = memref.load %arg3[%c0_5] : memref<1xf32, #tpu.memory_space<smem>>
    %20 = vector.broadcast %19 : f32 to vector<2x256xf32>
    %21 = arith.addf %18, %20 : vector<2x256xf32>
    %cst = arith.constant 0.000000e+00 : f32
    %22 = vector.broadcast %cst : f32 to vector<2x256xf32>
    %23 = arith.subf %22, %21 : vector<2x256xf32>
    %24 = math.exp %23 : vector<2x256xf32>
    %cst_6 = arith.constant 1.000000e+00 : f32
    %25 = vector.broadcast %cst_6 : f32 to vector<2x256xf32>
    %26 = arith.addf %25, %24 : vector<2x256xf32>
    %cst_7 = arith.constant 1.000000e+00 : f32
    %27 = vector.broadcast %cst_7 : f32 to vector<2x256xf32>
    %28 = arith.divf %27, %26 : vector<2x256xf32>
    %c0_8 = arith.constant 0 : index
    %c0_9 = arith.constant 0 : index
    %29 = vector.load %arg1[%c0_8, %c0_9] : memref<2x1024xf32, #tpu.memory_space<vmem>>, vector<2x256xf32>
    %30 = arith.mulf %29, %28 : vector<2x256xf32>
    %c0_10 = arith.constant 0 : index
    %c0_11 = arith.constant 0 : index
    %31 = vector.load %arg4[%c0_10, %c0_11] : memref<2x1024xf32, #tpu.memory_space<vmem>>, vector<2x256xf32>
    tpu.vector_store %arg4[%c0_10, %c0_11], %30 {strides = array<i32>} : memref<2x1024xf32, #tpu.memory_space<vmem>>, vector<2x256xf32>,
    %c0_12 = arith.constant 0 : index
    %c256_13 = arith.constant 256 : index
    %32 = vector.load %arg1[%c0_12, %c256_13] : memref<2x1024xf32, #tpu.memory_space<vmem>>, vector<2x256xf32>
    %33 = arith.mulf %32, %28 : vector<2x256xf32>
    %c0_14 = arith.constant 0 : index
    %c256_15 = arith.constant 256 : index
    %34 = vector.load %arg4[%c0_14, %c256_15] : memref<2x1024xf32, #tpu.memory_space<vmem>>, vector<2x256xf32>
    tpu.vector_store %arg4[%c0_14, %c256_15], %33 {strides = array<i32>} : memref<2x1024xf32, #tpu.memory_space<vmem>>, vector<2x256xf32>,
    %c0_16 = arith.constant 0 : index
    %c512_17 = arith.constant 512 : index
    %35 = vector.load %arg1[%c0_16, %c512_17] : memref<2x1024xf32, #tpu.memory_space<vmem>>, vector<2x256xf32>
    %36 = arith.mulf %35, %28 : vector<2x256xf32>
    %c0_18 = arith.constant 0 : index
    %c512_19 = arith.constant 512 : index
    %37 = vector.load %arg4[%c0_18, %c512_19] : memref<2x1024xf32, #tpu.memory_space<vmem>>, vector<2x256xf32>
    tpu.vector_store %arg4[%c0_18, %c512_19], %36 {strides = array<i32>} : memref<2x1024xf32, #tpu.memory_space<vmem>>, vector<2x256xf32>,
    %c0_20 = arith.constant 0 : index
    %c768_21 = arith.constant 768 : index
    %38 = vector.load %arg1[%c0_20, %c768_21] : memref<2x1024xf32, #tpu.memory_space<vmem>>, vector<2x256xf32>
    %39 = arith.mulf %38, %28 : vector<2x256xf32>
    %c0_22 = arith.constant 0 : index
    %c768_23 = arith.constant 768 : index
    %40 = vector.load %arg4[%c0_22, %c768_23] : memref<2x1024xf32, #tpu.memory_space<vmem>>, vector<2x256xf32>
    tpu.vector_store %arg4[%c0_22, %c768_23], %39 {strides = array<i32>} : memref<2x1024xf32, #tpu.memory_space<vmem>>, vector<2x256xf32>,
    return
  }
  func.func @transform_0(%arg0: i32) -> (i32, i32) {
    %c0_i32 = arith.constant 0 : i32
    %c0_i32_0 = arith.constant 0 : i32
    return %arg0, %c0_i32 : i32, i32
  }
  func.func @transform_1(%arg0: i32) -> i32 {
    %c0_i32 = arith.constant 0 : i32
    %c0_i32_0 = arith.constant 0 : i32
    return %c0_i32 : i32
  }
  func.func @transform_2(%arg0: i32) -> i32 {
    %c0_i32 = arith.constant 0 : i32
    %c0_i32_0 = arith.constant 0 : i32
    return %c0_i32 : i32
  }
  func.func @transform_3(%arg0: i32) -> (i32, i32) {
    %c0_i32 = arith.constant 0 : i32
    %c0_i32_0 = arith.constant 0 : i32
    return %arg0, %c0_i32 : i32, i32
  }
}

</mosaic_0001>

<bundles_post_ra>
// kernel: tpu_custom_call.1
= control target key start
LH: loop header
LB: loop body
LE: loop exit
PB: predicated region body
PF: predicated region fallthrough
CT: control target
= control target key end

     0   :  { %9 = vsyncpa [#allocation4], 0  ;;  %s221_s0 = inlined_call_operand.hbm [shape: f32[2,1024], index: 0, kind: input, shape index: {}]   ;;  %s222_s1 = inlined_call_operand.vmem [shape: f32[4], index: 1, kind: input, shape index: {}]   ;;  %s223_s2 = inlined_call_operand.<no memory space> [shape: f32[1], index: 2, kind: input, shape index: {}]   ;;  %s224_s3 = inlined_call_operand.hbm [shape: f32[2,1024], index: 3, kind: output, shape index: {}]  }
   0x1   :  { %10 = vsyncpa [#allocation6], 0 }
   0x2   :  { %11 = vsyncpa [#allocation5], 0  ;;  %s28_s14 = sshll.u32 %s222_s1, 4  ;;  %s168_s15 = smov [#allocation3]   ;;  %s29_s14 = int_to_ptr.vmem [resolvable:$true] %s28_s14 }
   0x3   :  { %s18_s16 = sshll.u32 %s168_s15, 4  ;;  %s106_s19 = scalar_lea.hbm %s221_s0, 256  ;;  %s19_s16 = int_to_ptr.vmem [resolvable:$true] %s18_s16 }
   0x4   :  { %p107_p0 = scmp.ne.s32.totalorder %s221_s0, %s106_s19  ;;  %p110_p1 = scmp.lt.u32.totalorder %s106_s19, %s221_s0 }
   0x6   :  { %p112_p2 = pnand %p110_p1, %p107_p0 }
   0x8   :  { %115 = shalt.err (!%p112_p2)
}
   0x9   :  { %s116_s24 = scalar_lea.vmem %s19_s16, 256  ;;  %p121_p4 = scmp.lt.s32.totalorder %s19_s16, %s19_s16 }
   0xa   :  { %p117_p3 = scmp.ne.s32.totalorder %s19_s16, %s116_s24  ;;  %p122_p5 = scmp.lt.s32.totalorder %s116_s24, %s116_s24 }
   0xc   :  { %p123_p6 = por %p122_p5, %p121_p4 }
   0xe   :  { %p124_p7 = pnand %p123_p6, %p117_p3 }
  0x10   :  { %127 = shalt.err (!%p124_p7)
}
  0x11   :  { %21 = dma.hbm_to_vmem [thread:$0]  %s221_s0, 256, %s19_s16, [#allocation4]  }
  0x12   :  { %s128_s26 = scalar_lea.vmem %s29_s14, 16  ;;  %p133_p9 = scmp.lt.s32.totalorder %s29_s14, %s29_s14 }
  0x13   :  { %p129_p8 = scmp.ne.s32.totalorder %s29_s14, %s128_s26  ;;  %p134_p10 = scmp.lt.s32.totalorder %s128_s26, %s128_s26 }
  0x15   :  { %p135_p11 = por %p134_p10, %p133_p9 }
  0x17   :  { %p136_p12 = pnand %p135_p11, %p129_p8 }
  0x19   :  { %139 = shalt.err (!%p136_p12)
}
  0x1a   :  { %s169_s27 = smov [#allocation7]  }
  0x1b   :  { %31 = dma.vmem_to_smem %s29_s14, 16, %s169_s27, [#allocation6]  }
  0x1c   :  { %162 = dma.done.wait [#allocation4], 256  }
  0x1d   :  { %163 = vsyncadd [#allocation4], 4294967040 }
  0x1e   :  { %164 = dma.done.wait [#allocation6], 16  }
  0x1f   :  { %165 = vsyncadd [#allocation6], 4294967280 }
  0x20   :  { %40 = sfence }
  0x21   :  { %s42_s28 = sld [smem:[#allocation7]]  ;;  %s96_s29 = sld [smem:[#allocation7 + $0x1]]  ;;  %v41_v0 = vld [vmem:[#allocation3] sm:$0xf]  ;;  %v45_v1 = vld [vmem:[#allocation3 + $0x4] sm:$0xf]  ;;  %v61_v14 = vstv %s223_s2 }
  0x22   :  { %s97_s30 = sld [smem:[#allocation7 + $0x2]]  ;;  %s98_s4 = sld [smem:[#allocation7 + $0x3]]  ;;  %v50_v2 = vld [vmem:[#allocation3 + $0x8] sm:$0xf]  ;;  %v55_v7 = vld [vmem:[#allocation3 + $0xc] sm:$0xf] }
  0x23   :  { %v71_v21 = vld [vmem:[#allocation3 + $0x4] sm:$0xf]  ;;  %v74_v22 = vld [vmem:[#allocation3 + $0x8] sm:$0xf]  ;;  %v77_v23 = vld [vmem:[#allocation3 + $0xc] sm:$0xf] }
  0x24   :  { %s170_s6 = smov [#allocation8]  }
  0x25   :  { %s86_s7 = sshll.u32 %s170_s6, 4  ;;  %s87_s7 = int_to_ptr.vmem [resolvable:$true] %s86_s7 }
  0x26   :  { %s140_s2 = scalar_lea.vmem %s87_s7, 256  ;;  %p145_p0 = scmp.lt.s32.totalorder %s87_s7, %s87_s7 }
  0x27   :  { %v43_v3 = vstv %s42_s28  ;;  %v47_v5 = vstv %s96_s29  ;;  %p141_p13 = scmp.ne.s32.totalorder %s87_s7, %s140_s2  ;;  %p146_p1 = scmp.lt.s32.totalorder %s140_s2, %s140_s2 }
  0x28   :  { %v44_v4 = vmul.f32 %v43_v3, %v41_v0  ;;  %v52_v6 = vstv %s97_s30  ;;  %v48_v8 = vmul.f32 %v47_v5, %v45_v1  ;;  %v57_v10 = vstv %s98_s4 }
  0x29   :  { %v53_v9 = vmul.f32 %v52_v6, %v50_v2  ;;  %v58_v12 = vmul.f32 %v57_v10, %v55_v7  ;;  %p147_p2 = por %p146_p1, %p145_p0 }
  0x2a   :  { %v49_v11 = vadd.f32 %v48_v8, %v44_v4 }
  0x2b   :  { %p148_p3 = pnand %p147_p2, %p141_p13 }
  0x2c   :  { %v54_v13 = vadd.f32 %v53_v9, %v49_v11 }
  0x2e   :  { %v59_v15 = vadd.f32 %v58_v12, %v54_v13 }
  0x30   :  { %v62_v16 = vadd.f32 %v61_v14, %v59_v15 }
  0x32   :  { %v63_v17 = vsub.f32 0.0, %v62_v16 }
  0x34   :  { %v64_v18 = vmul.f32 1.442695, %v63_v17 }
  0x36   :  { %102 = vpow2.f32 %v64_v18 }
  0x40   :  { %v103_v19 = vpop.eup %102 }
  0x41   :  { %v66_v20 = vadd.f32 1.0, %v103_v19 }
  0x43   :  { %104 = vrcp.f32 %v66_v20 }
  0x4d   :  { %v105_v24 = vpop.eup %104 }
  0x4e   :  { %v69_v25 = vmul.f32 %v105_v24, %v41_v0  ;;  %v72_v26 = vmul.f32 %v105_v24, %v71_v21  ;;  %v75_v27 = vmul.f32 %v105_v24, %v74_v22  ;;  %v78_v28 = vmul.f32 %v105_v24, %v77_v23 }
  0x50   :  { %70 = vst [vmem:[#allocation8] sm:$0xf] %v69_v25  ;;  %73 = vst [vmem:[#allocation8 + $0x4] sm:$0xf] %v72_v26 }
  0x51   :  { %76 = vst [vmem:[#allocation8 + $0x8] sm:$0xf] %v75_v27  ;;  %79 = vst [vmem:[#allocation8 + $0xc] sm:$0xf] %v78_v28 }
  0x52   :  { %151 = shalt.err (!%p148_p3)
}
  0x53   :  { %s152_s10 = scalar_lea.hbm %s224_s3, 256 }
  0x54   :  { %p153_p4 = scmp.ne.s32.totalorder %s224_s3, %s152_s10  ;;  %p156_p5 = scmp.lt.u32.totalorder %s152_s10, %s224_s3 }
  0x56   :  { %p158_p6 = pnand %p156_p5, %p153_p4 }
  0x58   :  { %161 = shalt.err (!%p158_p6)
}
  0x59   :  { %89 = dma.vmem_to_hbm [thread:$0]  %s87_s7, 256, %s224_s3, [#allocation5]  }
  0x5a   :  { %166 = dma.done.wait [#allocation5], 256  }
  0x5b   :  { %167 = vsyncadd [#allocation5], 4294967040 }
  0x5c   :  { %93 = vsyncpa [#allocation4], 1 }
  0x5d   :  { %94 = vsyncpa [#allocation5], 1 }
  0x5e   :  { %95 = vsyncpa [#allocation6], 1 }

</bundles_post_ra>
